<compile_context>
chip_gen: v7x
topology: tpu7x:2x2x1
jax: 0.10.0
libtpu: 0.0.40
codegen_flags: <defaults>
</compile_context>

<pallas_src>
import jax
import jax.numpy as jnp
from jax import lax
from jax.experimental import pallas as pl
from jax.experimental.pallas import tpu as pltpu


# ---------------------------------------------------------------------------
# Kernel 1: stats-only fused IDConv + TemporalConv (im2col matmul)
#           -> per-(f,s) [sum, sum of squares] partials for BatchNorm
# ---------------------------------------------------------------------------
def make_stats_kernel(K, Tp):
    def kernel(x_ref, wcomb_ref, stats_ref):
        # x_ref    : (B, C, T)    VMEM  raw signal (time on lanes)
        # wcomb_ref: (F*S, K*C)   VMEM  fused spatial*FIR weight
        # stats_ref: (1, F*S, 2)  VMEM  per-(f,s) [sum, sum of squares]
        B = x_ref.shape[0]
        FS = wcomb_ref.shape[0]
        wc = wcomb_ref[...]                                   # hoisted load

        acc1 = jnp.zeros((FS, Tp), jnp.float32)
        acc2 = jnp.zeros((FS, Tp), jnp.float32)
        for b in range(B):
            # im2col: row k*C + c holds x[c, k:k+Tp]
            col = jnp.concatenate(
                [x_ref[b, :, k:k + Tp] for k in range(K)], axis=0)  # (K*C, Tp)
            fb = jnp.dot(wc, col, preferred_element_type=jnp.float32)  # (F*S, Tp)
            acc1 = acc1 + fb
            acc2 = acc2 + fb * fb
        # single XLU lane-reduce per grid step
        stats_ref[0] = jnp.concatenate(
            [jnp.sum(acc1, axis=1, keepdims=True),
             jnp.sum(acc2, axis=1, keepdims=True)], axis=1)   # (F*S, 2)
    return kernel


def front_stats(x_nct, wcomb, K, block_n):
    N, C, T = x_nct.shape
    FS, KC = wcomb.shape
    Tp = T - K + 1
    assert N % block_n == 0
    G = N // block_n
    return pl.pallas_call(
        make_stats_kernel(K, Tp),
        out_shape=jax.ShapeDtypeStruct((G, FS, 2), jnp.float32),
        grid_spec=pltpu.PrefetchScalarGridSpec(
            num_scalar_prefetch=0,
            grid=(G,),
            in_specs=[pl.BlockSpec((block_n, C, T), lambda g: (g, 0, 0)),
                      pl.BlockSpec((FS, KC), lambda g: (0, 0))],
            out_specs=pl.BlockSpec((1, FS, 2), lambda g: (g, 0, 0)),
        ),
        compiler_params=pltpu.CompilerParams(dimension_semantics=("parallel",)),
    )(x_nct, wcomb)


# ---------------------------------------------------------------------------
# Kernel 2: recompute front features from raw x_t, then BN + square +
#           avg-pool + DRConv + softmax heads + pairwise distance
# ---------------------------------------------------------------------------
def make_head_kernel(K, Tp):
    def kernel(x_ref, wcbn_ref, b_ref, poolT_ref, wdr_ref, pperm_ref, wcls_ref,
               out_ref, dsum_ref):
        # x_ref    : (B, C, T)     VMEM  raw target signal
        # wcbn_ref : (F*S, K*C)    VMEM  BN-scale-folded fused front weight
        # b_ref    : (F*S, 1)      VMEM  BN shift (beta - mean*scale, repeated over S)
        # poolT_ref: (Tp, NP)      VMEM  average-pool matrix
        # wdr_ref  : (ND, F*S)     VMEM  DRConv weight (flattened)
        # pperm_ref: (NP, NP)      VMEM  permutation matrix (for the `dis` module)
        # wcls_ref : (NC, ND)      VMEM  ClassConv weight
        # out_ref  : (B, NC, NP)   VMEM  log-softmax class scores
        # dsum_ref : (1, 1, 1)     VMEM  per-step sum of |g - g_perm + eps|
        B = x_ref.shape[0]
        wc = wcbn_ref[...]
        bsh = b_ref[...]
        poolT = poolT_ref[...]
        wdr = wdr_ref[...]
        pperm = pperm_ref[...]
        wcls = wcls_ref[...]

        dtot = jnp.zeros((1, 1), jnp.float32)
        for bi in range(B):
            col = jnp.concatenate(
                [x_ref[bi, :, k:k + Tp] for k in range(K)], axis=0)   # (K*C, Tp)
            # fused IDConv+TemporalConv+BN-scale (MXU) then BN shift
            yn = jnp.dot(wc, col, preferred_element_type=jnp.float32) + bsh
            sq = yn * yn                                              # torch.mul(x, x)
            pooled = jnp.dot(sq, poolT,
                             preferred_element_type=jnp.float32)      # AvgPool2d (FS, NP)
            x_dr = jnp.dot(wdr, pooled,
                           preferred_element_type=jnp.float32)        # DRConv   (ND, NP)

            # LogSoftmax over DR channels (torch dim=1 -> axis 0 here)
            m = jnp.max(x_dr, axis=0, keepdims=True)
            ls = x_dr - m - jnp.log(jnp.sum(jnp.exp(x_dr - m), axis=0, keepdims=True))
            g = jax.nn.sigmoid(ls * 3.0)                              # mode_loss == 'fpr'
            g_perm = jnp.dot(g, pperm,
                             preferred_element_type=jnp.float32)      # g[:, :, randperm(30)]
            # F.pairwise_distance over trailing singleton dim == |diff + 1e-6|
            dtot = dtot + jnp.sum(jnp.abs(g - g_perm + 1e-6),
                                  axis=(0, 1), keepdims=True)

            # ClassConv (1x1 conv == matmul) + LogSoftmax over classes
            xc = jnp.dot(wcls, x_dr, preferred_element_type=jnp.float32)  # (NC, NP)
            m2 = jnp.max(xc, axis=0, keepdims=True)
            out_ref[bi] = xc - m2 - jnp.log(
                jnp.sum(jnp.exp(xc - m2), axis=0, keepdims=True))

        dsum_ref[0] = dtot
    return kernel


def head(xt, wcomb_bn, b_fs, poolT, wdr_flat, pperm, wcls, K, block_n):
    N, C, T = xt.shape
    FS, KC = wcomb_bn.shape
    Tp = T - K + 1
    NP = poolT.shape[1]
    ND = wdr_flat.shape[0]
    NC = wcls.shape[0]
    assert N % block_n == 0
    G = N // block_n
    out, dsum = pl.pallas_call(
        make_head_kernel(K, Tp),
        out_shape=(jax.ShapeDtypeStruct((N, NC, NP), jnp.float32),
                   jax.ShapeDtypeStruct((G, 1, 1), jnp.float32)),
        grid_spec=pltpu.PrefetchScalarGridSpec(
            num_scalar_prefetch=0,
            grid=(G,),
            in_specs=[
                pl.BlockSpec((block_n, C, T), lambda g: (g, 0, 0)),
                pl.BlockSpec((FS, KC), lambda g: (0, 0)),
                pl.BlockSpec((FS, 1), lambda g: (0, 0)),
                pl.BlockSpec((Tp, NP), lambda g: (0, 0)),
                pl.BlockSpec((ND, FS), lambda g: (0, 0)),
                pl.BlockSpec((NP, NP), lambda g: (0, 0)),
                pl.BlockSpec((NC, ND), lambda g: (0, 0)),
            ],
            out_specs=[
                pl.BlockSpec((block_n, NC, NP), lambda g: (g, 0, 0)),
                pl.BlockSpec((1, 1, 1), lambda g: (g, 0, 0)),
            ],
        ),
        compiler_params=pltpu.CompilerParams(dimension_semantics=("parallel",)),
    )(xt, wcomb_bn, b_fs, poolT, wdr_flat, pperm, wcls)
    return out, dsum


# ---------------------------------------------------------------------------
# Full forward (training branch): glue = weight fusion, stat combine,
# pooling / permutation matrix construction.
# ---------------------------------------------------------------------------
def itnet_heavy_forward(x_t, x_s, params, perm, pool_size, pool_stride):
    Nt = x_t.shape[0]
    Ns = x_s.shape[0]
    # NCHW (N, C, T, 1) -> (N, C, T): time stays on the lane axis, no transpose.
    xt = x_t[..., 0].astype(jnp.float32)
    xs = x_s[..., 0].astype(jnp.float32)

    w_sp = params['w_spatial']          # (S, C)
    w_fir = params['w_fir']             # (F, K)
    S, C = w_sp.shape
    F, K = w_fir.shape
    T = xt.shape[2]
    Tp = T - K + 1
    FS = F * S

    # Fused IDConv+TemporalConv weight: wcomb[f*S+s, k*C+c] = w_fir[f,k]*w_sp[s,c]
    wcomb = jnp.einsum('fk,sc->fskc', w_fir, w_sp).reshape(FS, K * C)

    # IDConv_s/IDConv_t and TemporalConv_s/TemporalConv_t share the same weights.
    stats_t = front_stats(xt, wcomb, K, block_n=Nt)
    stats_s = front_stats(xs, wcomb, K, block_n=Ns)

    NB = Nt + Ns
    count = NB * Tp * S
    # BatchNorm2d training-mode batch stats (biased var) from in-kernel partials.
    s1 = (stats_t[:, :, 0].sum(0) + stats_s[:, :, 0].sum(0)).reshape(F, S).sum(1)
    s2 = (stats_t[:, :, 1].sum(0) + stats_s[:, :, 1].sum(0)).reshape(F, S).sum(1)
    mean = s1 / count
    var = s2 / count - mean * mean
    a = params['gamma'] / jnp.sqrt(var + 1e-5)
    b = params['beta'] - mean * a
    a_fs = jnp.repeat(a, S).reshape(FS, 1)
    b_fs = jnp.repeat(b, S).reshape(FS, 1)
    # Fold the BN scale into the fused front weight (once, weight-only fold).
    wcomb_bn = a_fs * wcomb

    NP = (Tp - pool_size) // pool_stride + 1
    t_idx = jnp.arange(Tp)[:, None]
    j_idx = jnp.arange(NP)[None, :]
    poolT = (((t_idx >= j_idx * pool_stride) &
              (t_idx < j_idx * pool_stride + pool_size)).astype(jnp.float32)
             / pool_size)                                           # (Tp, NP)
    ND = params['w_dr'].shape[0]
    pperm = (jnp.arange(NP)[:, None] == perm[None, :]).astype(jnp.float32)  # (NP, NP)
    wdr_flat = params['w_dr'].reshape(ND, FS)                       # (ND, F*S)

    out, dsum = head(xt, wcomb_bn, b_fs, poolT, wdr_flat, pperm,
                     params['w_class'], K, block_n=Nt)
    dis = jnp.sum(dsum) / (Nt * ND * NP)
    # torch `x.squeeze()`: (Nt, n_class, NP, 1) -> (Nt, n_class, NP)
    return out, dis


# ---------------------------------------------------------------------------
# Pure-JAX reference for verification
# ---------------------------------------------------------------------------
def reference_forward(x_t, x_s, p, perm, pool_size, pool_stride):
    P = lax.Precision.HIGHEST
    F, K = p['w_fir'].shape

    def front(x):
        xx = jnp.transpose(x[..., 0], (0, 2, 1))
        y = jnp.einsum('ntc,sc->nts', xx, p['w_spatial'], precision=P)
        Tp = y.shape[1] - K + 1
        feat = jnp.zeros((y.shape[0], F, Tp, y.shape[2]), jnp.float32)
        for k in range(K):
            feat = feat + p['w_fir'][None, :, k, None, None] * y[:, None, k:k + Tp, :]
        return feat

    ft, fs = front(x_t), front(x_s)
    xcat = jnp.concatenate([ft, fs], 0)
    mean = jnp.mean(xcat, axis=(0, 2, 3))
    var = jnp.var(xcat, axis=(0, 2, 3))
    xn = (xcat - mean[None, :, None, None]) * lax.rsqrt(var + 1e-5)[None, :, None, None]
    xn = xn * p['gamma'][None, :, None, None] + p['beta'][None, :, None, None]
    sq = xn * xn
    Tp = sq.shape[2]
    NP = (Tp - pool_size) // pool_stride + 1
    pooled = jnp.stack(
        [jnp.mean(sq[:, :, j * pool_stride:j * pool_stride + pool_size, :], axis=2)
         for j in range(NP)], axis=2)
    x_dr = jnp.einsum('nfts,dfs->ndt', pooled[:x_t.shape[0]], p['w_dr'], precision=P)
    ls = jax.nn.log_softmax(x_dr, axis=1)
    g = jax.nn.sigmoid(ls * 3.0)
    g_perm = g[:, :, perm]
    dis = jnp.mean(jnp.abs(g - g_perm + 1e-6))
    xc = jnp.einsum('ndt,cd->nct', x_dr, p['w_class'], precision=P)
    out = jax.nn.log_softmax(xc, axis=1)
    return out, dis


if __name__ == "__main__":
    # Small config consistent with the module; pooled length must be 30 so the
    # DRConv (30 channels) / randperm(30) pairwise-distance lines up, exactly
    # as in the original 875 / 51-tap / pool(100,25) configuration.
    Nt, Ns = 2, 2
    n_channel, input_length = 8, 70
    n_spatial, n_fir, fir_length = 4, 4, 5
    pool_size, pool_stride = 8, 2
    n_class, n_dr = 4, 30
    Tp = input_length - fir_length + 1
    NP = (Tp - pool_size) // pool_stride + 1
    assert NP == n_dr == 30

    key = jax.random.PRNGKey(0)
    ks = jax.random.split(key, 9)
    params = {
        'w_spatial': 0.3 * jax.random.normal(ks[0], (n_spatial, n_channel), jnp.float32),
        'w_fir':     0.3 * jax.random.normal(ks[1], (n_fir, fir_length), jnp.float32),
        'gamma':     1.0 + 0.1 * jax.random.normal(ks[2], (n_fir,), jnp.float32),
        'beta':      0.1 * jax.random.normal(ks[3], (n_fir,), jnp.float32),
        'w_dr':      0.3 * jax.random.normal(ks[4], (n_dr, n_fir, n_spatial), jnp.float32),
        'w_class':   0.3 * jax.random.normal(ks[5], (n_class, n_dr), jnp.float32),
    }
    x_t = jax.random.normal(ks[6], (Nt, n_channel, input_length, 1), jnp.float32)
    x_s = jax.random.normal(ks[7], (Ns, n_channel, input_length, 1), jnp.float32)
    perm = jax.random.permutation(ks[8], n_dr)   # stands in for torch.randperm(30)

    out, dis = itnet_heavy_forward(x_t, x_s, params, perm, pool_size, pool_stride)
    out, dis = jax.block_until_ready((out, dis))

    ref_out, ref_dis = reference_forward(x_t, x_s, params, perm, pool_size, pool_stride)

    assert out.shape == (Nt, n_class, NP), out.shape
    assert jnp.allclose(out, ref_out, atol=5e-2, rtol=5e-2), "class logits mismatch"
    assert jnp.allclose(dis, ref_dis, atol=5e-2, rtol=5e-2), "dis mismatch"
    print("KERNEL_OK")
</pallas_src>

<mosaic_0001>
module attributes {stable_mosaic.version = 11 : i64} {
  func.func @kernel(%arg0: i32, %arg1: memref<2x8x70xf32, #tpu.memory_space<vmem>>, %arg2: memref<16x40xf32, #tpu.memory_space<vmem>>, %arg3: memref<1x16x2xf32, #tpu.memory_space<vmem>>) attributes {dimension_semantics = [#tpu.dimension_semantics<parallel>], iteration_bounds = array<i64: 1>, scalar_prefetch = 0 : i64, scratch_operands = 0 : i64, tpu.core_type = #tpu.core_type<tc>, window_params = [{transform_indices = @transform_0, window_bounds = array<i64: 2, 8, 70>}, {pipeline_mode = #tpu.pipeline_mode<synchronous>, transform_indices = @transform_1, window_bounds = array<i64: 16, 40>}, {transform_indices = @transform_2, window_bounds = array<i64: 1, 16, 2>}]} {
    %c0 = arith.constant 0 : index
    %c0_0 = arith.constant 0 : index
    %0 = vector.load %arg2[%c0, %c0_0] : memref<16x40xf32, #tpu.memory_space<vmem>>, vector<16x40xf32>
    %cst = arith.constant 0.000000e+00 : f32
    %1 = vector.broadcast %cst : f32 to vector<16x66xf32>
    %cst_1 = arith.constant 0.000000e+00 : f32
    %2 = vector.broadcast %cst_1 : f32 to vector<16x66xf32>
    %c0_2 = arith.constant 0 : index
    %c0_3 = arith.constant 0 : index
    %c0_4 = arith.constant 0 : index
    %3 = vector.load %arg1[%c0_2, %c0_3, %c0_4] : memref<2x8x70xf32, #tpu.memory_space<vmem>>, vector<1x8x66xf32>
    %4 = vector.shape_cast %3 : vector<1x8x66xf32> to vector<8x66xf32>
    %c0_5 = arith.constant 0 : index
    %c0_6 = arith.constant 0 : index
    %c1 = arith.constant 1 : index
    %5 = vector.load %arg1[%c0_5, %c0_6, %c1] : memref<2x8x70xf32, #tpu.memory_space<vmem>>, vector<1x8x66xf32>
    %6 = vector.shape_cast %5 : vector<1x8x66xf32> to vector<8x66xf32>
    %c0_7 = arith.constant 0 : index
    %c0_8 = arith.constant 0 : index
    %c2 = arith.constant 2 : index
    %7 = vector.load %arg1[%c0_7, %c0_8, %c2] : memref<2x8x70xf32, #tpu.memory_space<vmem>>, vector<1x8x66xf32>
    %8 = vector.shape_cast %7 : vector<1x8x66xf32> to vector<8x66xf32>
    %c0_9 = arith.constant 0 : index
    %c0_10 = arith.constant 0 : index
    %c3 = arith.constant 3 : index
    %9 = vector.load %arg1[%c0_9, %c0_10, %c3] : memref<2x8x70xf32, #tpu.memory_space<vmem>>, vector<1x8x66xf32>
    %10 = vector.shape_cast %9 : vector<1x8x66xf32> to vector<8x66xf32>
    %c0_11 = arith.constant 0 : index
    %c0_12 = arith.constant 0 : index
    %c4 = arith.constant 4 : index
    %11 = vector.load %arg1[%c0_11, %c0_12, %c4] : memref<2x8x70xf32, #tpu.memory_space<vmem>>, vector<1x8x66xf32>
    %12 = vector.shape_cast %11 : vector<1x8x66xf32> to vector<8x66xf32>
    %13 = tpu.concatenate %4, %6, %8, %10, %12 in 0 : vector<8x66xf32>, vector<8x66xf32>, vector<8x66xf32>, vector<8x66xf32>, vector<8x66xf32> -> vector<40x66xf32>
    %cst_13 = arith.constant dense<0.000000e+00> : vector<16x66xf32>
    %14 = tpu.matmul %0, %13, %cst_13 {dimension_numbers = #tpu.dot_dimension_numbers<[1], [0], [0], [1], [0, 0, 1, 1], [], []>} : vector<16x40xf32>, vector<40x66xf32>, vector<16x66xf32> -> vector<16x66xf32>
    %15 = arith.addf %1, %14 : vector<16x66xf32>
    %16 = arith.mulf %14, %14 : vector<16x66xf32>
    %17 = arith.addf %2, %16 : vector<16x66xf32>
    %c1_14 = arith.constant 1 : index
    %c0_15 = arith.constant 0 : index
    %c0_16 = arith.constant 0 : index
    %18 = vector.load %arg1[%c1_14, %c0_15, %c0_16] : memref<2x8x70xf32, #tpu.memory_space<vmem>>, vector<1x8x66xf32>
    %19 = vector.shape_cast %18 : vector<1x8x66xf32> to vector<8x66xf32>
    %c1_17 = arith.constant 1 : index
    %c0_18 = arith.constant 0 : index
    %c1_19 = arith.constant 1 : index
    %20 = vector.load %arg1[%c1_17, %c0_18, %c1_19] : memref<2x8x70xf32, #tpu.memory_space<vmem>>, vector<1x8x66xf32>
    %21 = vector.shape_cast %20 : vector<1x8x66xf32> to vector<8x66xf32>
    %c1_20 = arith.constant 1 : index
    %c0_21 = arith.constant 0 : index
    %c2_22 = arith.constant 2 : index
    %22 = vector.load %arg1[%c1_20, %c0_21, %c2_22] : memref<2x8x70xf32, #tpu.memory_space<vmem>>, vector<1x8x66xf32>
    %23 = vector.shape_cast %22 : vector<1x8x66xf32> to vector<8x66xf32>
    %c1_23 = arith.constant 1 : index
    %c0_24 = arith.constant 0 : index
    %c3_25 = arith.constant 3 : index
    %24 = vector.load %arg1[%c1_23, %c0_24, %c3_25] : memref<2x8x70xf32, #tpu.memory_space<vmem>>, vector<1x8x66xf32>
    %25 = vector.shape_cast %24 : vector<1x8x66xf32> to vector<8x66xf32>
    %c1_26 = arith.constant 1 : index
    %c0_27 = arith.constant 0 : index
    %c4_28 = arith.constant 4 : index
    %26 = vector.load %arg1[%c1_26, %c0_27, %c4_28] : memref<2x8x70xf32, #tpu.memory_space<vmem>>, vector<1x8x66xf32>
    %27 = vector.shape_cast %26 : vector<1x8x66xf32> to vector<8x66xf32>
    %28 = tpu.concatenate %19, %21, %23, %25, %27 in 0 : vector<8x66xf32>, vector<8x66xf32>, vector<8x66xf32>, vector<8x66xf32>, vector<8x66xf32> -> vector<40x66xf32>
    %cst_29 = arith.constant dense<0.000000e+00> : vector<16x66xf32>
    %29 = tpu.matmul %0, %28, %cst_29 {dimension_numbers = #tpu.dot_dimension_numbers<[1], [0], [0], [1], [0, 0, 1, 1], [], []>} : vector<16x40xf32>, vector<40x66xf32>, vector<16x66xf32> -> vector<16x66xf32>
    %30 = arith.addf %15, %29 : vector<16x66xf32>
    %31 = arith.mulf %29, %29 : vector<16x66xf32>
    %32 = arith.addf %17, %31 : vector<16x66xf32>
    %cst_30 = arith.constant dense<0.000000e+00> : vector<16xf32>
    %33 = vector.multi_reduction <add>, %30, %cst_30 [1] : vector<16x66xf32> to vector<16xf32>
    %34 = vector.shape_cast %33 : vector<16xf32> to vector<16x1xf32>
    %cst_31 = arith.constant dense<0.000000e+00> : vector<16xf32>
    %35 = vector.multi_reduction <add>, %32, %cst_31 [1] : vector<16x66xf32> to vector<16xf32>
    %36 = vector.shape_cast %35 : vector<16xf32> to vector<16x1xf32>
    %37 = tpu.concatenate %34, %36 in 1 : vector<16x1xf32>, vector<16x1xf32> -> vector<16x2xf32>
    %c0_32 = arith.constant 0 : index
    %c0_33 = arith.constant 0 : index
    %c0_34 = arith.constant 0 : index
    %38 = vector.load %arg3[%c0_32, %c0_33, %c0_34] : memref<1x16x2xf32, #tpu.memory_space<vmem>>, vector<1x16x2xf32>
    %39 = vector.shape_cast %38 : vector<1x16x2xf32> to vector<16x2xf32>
    %40 = vector.shape_cast %37 : vector<16x2xf32> to vector<1x16x2xf32>
    tpu.vector_store %arg3[%c0_32, %c0_33, %c0_34], %40 {strides = array<i32>} : memref<1x16x2xf32, #tpu.memory_space<vmem>>, vector<1x16x2xf32>,
    return
  }
  func.func @transform_0(%arg0: i32) -> (i32, i32, i32) {
    %c0_i32 = arith.constant 0 : i32
    %c0_i32_0 = arith.constant 0 : i32
    %c0_i32_1 = arith.constant 0 : i32
    return %arg0, %c0_i32, %c0_i32_0 : i32, i32, i32
  }
  func.func @transform_1(%arg0: i32) -> (i32, i32) {
    %c0_i32 = arith.constant 0 : i32
    %c0_i32_0 = arith.constant 0 : i32
    %c0_i32_1 = arith.constant 0 : i32
    return %c0_i32, %c0_i32_0 : i32, i32
  }
  func.func @transform_2(%arg0: i32) -> (i32, i32, i32) {
    %c0_i32 = arith.constant 0 : i32
    %c0_i32_0 = arith.constant 0 : i32
    %c0_i32_1 = arith.constant 0 : i32
    return %arg0, %c0_i32, %c0_i32_0 : i32, i32, i32
  }
}

</mosaic_0001>

<bundles_post_ra>
// kernel: tpu_custom_call.1
= control target key start
LH: loop header
LB: loop body
LE: loop exit
PB: predicated region body
PF: predicated region fallthrough
CT: control target
= control target key end

     0   :  { %7 = vsyncpa [#allocation3], 0  ;;  %s456_s0 = inlined_call_operand.hbm [shape: f32[2,8,70], index: 0, kind: input, shape index: {}]   ;;  %s457_s1 = inlined_call_operand.hbm [shape: f32[16,40], index: 1, kind: input, shape index: {}]   ;;  %s458_s2 = inlined_call_operand.vmem [shape: f32[1,16,2], index: 2, kind: output, shape index: {}]  }
   0x1   :  { %8 = vsyncpa [#allocation5], 0  ;;  %s395_s9 = smov [#allocation2]   ;;  %s347_s13 = scalar_lea.hbm %s456_s0, 256 }
   0x2   :  { %s14_s10 = sshll.u32 %s395_s9, 4  ;;  %p348_p0 = scmp.ne.s32.totalorder %s456_s0, %s347_s13  ;;  %s15_s10 = int_to_ptr.vmem [resolvable:$true] %s14_s10 }
   0x3   :  { %p351_p1 = scmp.lt.u32.totalorder %s347_s13, %s456_s0 }
   0x5   :  { %p353_p2 = pnand %p351_p1, %p348_p0 }
   0x7   :  { %356 = shalt.err (!%p353_p2)
}
   0x8   :  { %s357_s18 = scalar_lea.vmem %s15_s10, 256  ;;  %p362_p4 = scmp.lt.s32.totalorder %s15_s10, %s15_s10 }
   0x9   :  { %p358_p3 = scmp.ne.s32.totalorder %s15_s10, %s357_s18  ;;  %p363_p5 = scmp.lt.s32.totalorder %s357_s18, %s357_s18 }
   0xb   :  { %p364_p6 = por %p363_p5, %p362_p4 }
   0xd   :  { %p365_p7 = pnand %p364_p6, %p358_p3 }
   0xf   :  { %368 = shalt.err (!%p365_p7)
}
  0x10   :  { %s396_s19 = smov 128   ;;  %s397_s20 = smov 8  }
  0x11   :  { %20 = dma.hbm_to_vmem [thread:$0]  %s456_s0, 256, %s15_s10, [#allocation3], %s396_s19, %s396_s19, %s397_s20  }
  0x12   :  { %s398_s23 = smov [#allocation4]   ;;  %s369_s27 = scalar_lea.hbm %s457_s1, 256 }
  0x13   :  { %s26_s24 = sshll.u32 %s398_s23, 4  ;;  %p370_p8 = scmp.ne.s32.totalorder %s457_s1, %s369_s27  ;;  %s27_s24 = int_to_ptr.vmem [resolvable:$true] %s26_s24 }
  0x14   :  { %p373_p9 = scmp.lt.u32.totalorder %s369_s27, %s457_s1 }
  0x16   :  { %p375_p10 = pnand %p373_p9, %p370_p8 }
  0x18   :  { %378 = shalt.err (!%p375_p10)
}
  0x19   :  { %s379_s4 = scalar_lea.vmem %s27_s24, 256  ;;  %p384_p12 = scmp.lt.s32.totalorder %s27_s24, %s27_s24 }
  0x1a   :  { %p380_p11 = scmp.ne.s32.totalorder %s27_s24, %s379_s4  ;;  %p385_p13 = scmp.lt.s32.totalorder %s379_s4, %s379_s4 }
  0x1c   :  { %p386_p0 = por %p385_p13, %p384_p12 }
  0x1e   :  { %p387_p1 = pnand %p386_p0, %p380_p11 }
  0x20   :  { %390 = shalt.err (!%p387_p1)
}
  0x21   :  { %32 = dma.hbm_to_vmem [thread:$0]  %s457_s1, 256, %s27_s24, [#allocation5], %s396_s19, %s396_s19, %s397_s20  }
  0x22   :  { %391 = dma.done.wait [#allocation3], 256  }
  0x23   :  { %392 = vsyncadd [#allocation3], 4294967040 }
  0x24   :  { %393 = dma.done.wait [#allocation5], 256  }
  0x25   :  { %394 = vsyncadd [#allocation5], 4294967040  ;;  %v41_v0 = vld [vmem:[#allocation2] sm:$0xff]  ;;  %v144_v1 = vld [vmem:[#allocation2 + $0x8] sm:$0xff]  ;;  %vm55_vm0 = vcmask 326656   ;;  %s399_s6 = smov 127  }
  0x26   :  { %v332_v2 = vpack.i.bf16 %v144_v1, %v41_v0  ;;  %v39_v3 = vld [vmem:[#allocation4] sm:$0xff]  ;;  %s400_s7 = smov 125   ;;  %s401_s8 = smov 126   ;;  %v40_v19 = vld [vmem:[#allocation4 + $0x8] sm:$0xff]  ;;  %vm239_vm1 = vcmask 539648   ;;  %vm252_vm2 = vcmask 7168  }
  0x27   :  { %292 = vmatprep.mubr.msk.f32.mxu0 %vm55_vm0, %v39_v3  ;;  %305 = vmatprep.mubr.msk.f32.mxu1 %vm55_vm0, %v39_v3  ;;  %s402_s1 = smov 124   ;;  %vm255_vm3 = vcmask 15360  }
  0x28   :  { %333 = vrot.lane.b32.xlu0 %v332_v2, %s399_s6  ;;  %343 = vrot.lane.b32.xlu1 %v332_v2, %s400_s7 }
  0x2c   :  { %338 = vrot.lane.b32.xlu0 %v332_v2, %s401_s8  ;;  %52 = vrot.lane.b32.xlu1 %v41_v0, %s402_s1 }
  0x30   :  { %155 = vrot.lane.b32.xlu0 %v144_v1, %s402_s1 }
  0x9a   :  { %v334_v4 = vpop.permute.xlu0 %333  ;;  %v344_v5 = vpop.permute.xlu1 %343 }
  0x9b   :  { %v336_v6 = vunpack.i.h.bf16 %v334_v4  ;;  %v335_v7 = vunpack.i.l.bf16 %v334_v4  ;;  %v346_v8 = vunpack.i.h.bf16 %v344_v5  ;;  %v345_v9 = vunpack.i.l.bf16 %v344_v5 }
  0x9d   :  { %v308_v10 = vpack.c.bf16 %v335_v7, %v41_v0  ;;  %v316_v11 = vpack.c.bf16 %v336_v6, %v144_v1 }
  0x9e   :  { %v339_v12 = vpop.permute.xlu0 %338  ;;  %v53_v17 = vpop.permute.xlu1 %52 }
  0x9f   :  { %v341_v13 = vunpack.i.h.bf16 %v339_v12  ;;  %v340_v14 = vunpack.i.l.bf16 %v339_v12  ;;  %309 = vmatprep.subr.bf16.mxu0 %v308_v10  ;;  %317 = vmatprep.subr.bf16.mxu1 %v316_v11 }
  0xa0   :  { %311 = vmatpush3.bf16.msra.mxu0 %v308_v10  ;;  %319 = vmatpush3.bf16.msra.mxu1 %v316_v11 }
  0xa1   :  { %v320_v15 = vpack.c.bf16 %v346_v8, %v341_v13  ;;  %v312_v16 = vpack.c.bf16 %v345_v9, %v340_v14 }
  0xa2   :  { %v156_v18 = vpop.permute.xlu0 %155 }
  0xa3   :  { %313 = vmatprep.subr.bf16.mxu0 %v312_v16  ;;  %321 = vmatprep.subr.bf16.mxu1 %v320_v15 }
  0xa4   :  { %315 = vmatpush3.bf16.msra.mxu0 %v312_v16  ;;  %323 = vmatpush3.bf16.msra.mxu1 %v320_v15 }
  0xa5   :  { %290 = vmatprep.subr.mxu0 %v53_v17  ;;  %303 = vmatprep.subr.mxu1 %v156_v18 }
  0xa8   :  { %291 = vmatpush3.msra.mxu0 %v53_v17  ;;  %304 = vmatpush3.msra.mxu1 %v156_v18 }
  0xa9   :  { %293 = vmatmul.mubr.msk.f32.vlgmr.msra.gmra.mrb[0].mxu0 %vm55_vm0, %v40_v19  ;;  %306 = vmatmul.mubr.msk.f32.vlgmr.msra.gmra.mrb[0].mxu1 %vm55_vm0, %v40_v19 }
 0x17c   :  { %v294_v20 = vpop.f32.mrb[0].mxu0  ;;  %v307_v21 = vpop.f32.mrb[0].mxu1 }
 0x17d   :  { %v140_v22 = vmul.f32 %v294_v20, %v294_v20  ;;  %v234_v23 = vadd.f32 %v307_v21, %v294_v20  ;;  %v236_v24 = vmul.f32 %v307_v21, %v307_v21  ;;  %v128_v25 = vpop.f32.mrb[1].mxu0  ;;  %v224_v26 = vpop.f32.mrb[1].mxu1 }
 0x17e   :  { %v139_v27 = vmul.f32 %v128_v25, %v128_v25  ;;  %v233_v28 = vadd.f32 %v224_v26, %v128_v25  ;;  %v235_v29 = vmul.f32 %v224_v26, %v224_v26 }
 0x17f   :  { %v243_v30 = vsel %vm239_vm1, %v234_v23, 0.0  ;;  %v238_v31 = vadd.f32 %v236_v24, %v140_v22 }
 0x180   :  { %244 = vadd.xlane.f32.xlu0 %v243_v30  ;;  %v240_v32 = vsel %vm239_vm1, %v233_v28, 0.0  ;;  %v237_v33 = vadd.f32 %v235_v29, %v139_v27 }
 0x181   :  { %241 = vadd.xlane.f32.xlu1 %v240_v32  ;;  %v249_v35 = vsel %vm239_vm1, %v238_v31, 0.0 }
 0x182   :  { %v246_v34 = vsel %vm239_vm1, %v237_v33, 0.0 }
 0x184   :  { %247 = vadd.xlane.f32.xlu0 %v246_v34 }
 0x185   :  { %250 = vadd.xlane.f32.xlu1 %v249_v35 }
 0x20d   :  { %v245_v36 = vpop.xlane.xlu0 %244 }
 0x20e   :  { %v242_v37 = vpop.xlane.xlu1 %241 }
 0x211   :  { %v248_v38 = vpop.xlane.xlu0 %247 }
 0x212   :  { %v253_v39 = vsel %vm252_vm2, %v242_v37, %v248_v38  ;;  %v251_v40 = vpop.xlane.xlu1 %250 }
 0x213   :  { %256 = vst.msk [vmem:[%s458_s2] sm:$0xff] %vm255_vm3, %v253_v39  ;;  %v254_v41 = vsel %vm252_vm2, %v245_v36, %v251_v40 }
 0x214   :  { %257 = vst.msk [vmem:[%s458_s2 + $0x8] sm:$0xff] %vm255_vm3, %v254_v41 }
 0x215   :  { %262 = vsyncpa [#allocation3], 1 }
 0x216   :  { %263 = vsyncpa [#allocation5], 1 }

</bundles_post_ra>
